<compile_context>
chip_gen: v7x
topology: tpu7x:2x2x1
jax: 0.10.0
libtpu: 0.0.40
codegen_flags: <defaults>
</compile_context>

<pallas_src>
import functools

import jax
import jax.numpy as jnp
from jax import lax
from jax.experimental import pallas as pl
from jax.experimental.pallas import tpu as pltpu

DIV_FLOW = 0.05          # matches EPELoss(div_flow=0.05)
_LANE = 128
_VMEM_LIMIT = 48 * 1024 * 1024


def _round_up(x, m):
    return -(-x // m) * m


def _round_down(x, m):
    return (x // m) * m


# --------------------------------------------------------------------------
# Dense path: inputs viewed as (N, C, R, 128); pixel rows on sublanes.
# --------------------------------------------------------------------------
def _epe_dense_kernel(o_ref, t_ref, psum_ref, *, nchan, rows_total, row_tile,
                      mask_rows):
    # o_ref / t_ref : (nb, C, row_tile, 128) input tiles
    # psum_ref      : (1, 1, 128) f32 partial-sum block (unique per grid step)
    sq = None
    for c in range(nchan):                                   # channel-unrolled
        oc = o_ref[:, c, :, :].astype(jnp.float32)           # (nb, row_tile, 128)
        tc = t_ref[:, c, :, :].astype(jnp.float32)
        d = DIV_FLOW * tc - oc
        sq = d * d if sq is None else sq + d * d
    if mask_rows:
        # Last row-block may extend past R: zero the undefined tail rows.
        r = pl.program_id(1)
        row = lax.broadcasted_iota(jnp.int32, sq.shape, 1)
        sq = jnp.where(row + r * row_tile < rows_total, sq, 0.0)
    epe = jnp.sqrt(sq)                                        # per-pixel EPE (EUP)
    part = jnp.sum(epe, axis=0)                               # reduce batch block
    psum_ref[0, 0] = jnp.sum(part, axis=0)                    # reduce row tile -> (128,)


# --------------------------------------------------------------------------
# Flat path (ragged H*W): inputs viewed as (N, C, H*W); mask the OOB tail.
# --------------------------------------------------------------------------
def _epe_flat_kernel(o_ref, t_ref, psum_ref, *, nchan, hw, block_p, mask_tail):
    # o_ref / t_ref : (nb, C, block_p) input tiles
    # psum_ref      : (1, nb, 1) f32 partial-sum block (unique per grid step)
    sq = None
    for c in range(nchan):                                    # channel-unrolled
        oc = o_ref[:, c, :].astype(jnp.float32)               # (nb, block_p)
        tc = t_ref[:, c, :].astype(jnp.float32)
        d = DIV_FLOW * tc - oc
        sq = d * d if sq is None else sq + d * d
    if mask_tail:
        # Boundary block: lanes past H*W are undefined -> zero them pre-sqrt.
        r = pl.program_id(1)
        col = lax.broadcasted_iota(jnp.int32, sq.shape, 1)
        sq = jnp.where(col + r * block_p < hw, sq, 0.0)
    epe = jnp.sqrt(sq)                                        # (nb, block_p)
    psum_ref[0] = jnp.sum(epe, axis=-1, keepdims=True)        # (nb, 1)


def epe_loss(output, target, *, block_bytes=4 * 1024 * 1024):
    """Pallas equivalent of EPELoss.forward.  Returns [scalar mean EPE]."""
    assert output.shape == target.shape, (output.shape, target.shape)
    N, C, H, W = output.shape
    hw = H * W
    itemsize = jnp.dtype(output.dtype).itemsize
    compiler_params = pltpu.CompilerParams(
        dimension_semantics=("parallel", "parallel"),
        vmem_limit_bytes=_VMEM_LIMIT)

    if hw % _LANE == 0:
        # ------------------------- dense path --------------------------------
        R = hw // _LANE
        sub = 8 if itemsize >= 4 else (16 if itemsize == 2 else 32)
        row_bytes = C * _LANE * itemsize          # one 128-pixel row, all channels
        img_bytes = R * row_bytes

        if img_bytes <= block_bytes:
            # Small feature map: whole image per block, pack batch items.
            row_tile = R
            nb = max(1, min(N, block_bytes // max(1, img_bytes)))
            while N % nb:
                nb -= 1
        else:
            # Large feature map: one batch item, byte-sized row tile.
            nb = 1
            row_tile = max(sub, _round_down(block_bytes // row_bytes, sub))

        n_blocks = N // nb
        r_blocks = pl.cdiv(R, row_tile)
        # v7x megacore balance: never leave a single (or strongly odd) grid for
        # a non-trivial single-image workload.
        if n_blocks == 1 and R >= 2 * sub and (r_blocks < 2 or r_blocks % 2 == 1):
            r_target = max(2, r_blocks + (r_blocks % 2))
            row_tile = max(sub, _round_up(pl.cdiv(R, r_target), sub))
            r_blocks = pl.cdiv(R, row_tile)
        mask_rows = (R % row_tile) != 0
        n_steps = n_blocks * r_blocks

        o = output.reshape(N, C, R, _LANE)        # free reshape, no HBM pass
        t = target.reshape(N, C, R, _LANE)

        kernel = functools.partial(_epe_dense_kernel, nchan=C, rows_total=R,
                                   row_tile=row_tile, mask_rows=mask_rows)
        partials = pl.pallas_call(
            kernel,
            out_shape=jax.ShapeDtypeStruct((n_steps, 1, _LANE), jnp.float32),
            grid_spec=pltpu.PrefetchScalarGridSpec(
                num_scalar_prefetch=0,
                grid=(n_blocks, r_blocks),
                in_specs=[
                    pl.BlockSpec((nb, C, row_tile, _LANE), lambda n, r: (n, 0, r, 0)),
                    pl.BlockSpec((nb, C, row_tile, _LANE), lambda n, r: (n, 0, r, 0)),
                ],
                out_specs=pl.BlockSpec(
                    (1, 1, _LANE), lambda n, r: (n * r_blocks + r, 0, 0)),
            ),
            compiler_params=compiler_params,
            cost_estimate=pl.CostEstimate(
                flops=4 * N * C * hw,
                transcendentals=N * hw,
                bytes_accessed=2 * N * C * hw * itemsize + n_steps * _LANE * 4),
        )(o, t)
    else:
        # ------------------------- flat (ragged) path ------------------------
        # Pack batch items (divisor of N, <= 8) to fill sublanes / fatten DMAs.
        nb = 1
        for cand in range(min(N, 8), 0, -1):
            if N % cand == 0:
                nb = cand
                break
        if hw < _LANE:
            block_p = hw                          # full dim -> no boundary block
        else:
            block_p = min(64 * 1024, _round_down(hw, _LANE))
            # Bound in-flight VMEM (2 inputs x 2 buffers, C padded to 8 sublanes,
            # plus ~3 f32 temporaries) to ~24 MiB.
            budget = 24 * 1024 * 1024

            def _vmem_need(p):
                return 4 * nb * 8 * p * itemsize + 3 * 8 * p * 4

            while block_p > _LANE and _vmem_need(block_p) > budget:
                block_p = max(_LANE, _round_down(block_p // 2, _LANE))

        n_blocks = N // nb
        r_blocks = pl.cdiv(hw, block_p)
        mask_tail = (hw % block_p) != 0
        n_steps = n_blocks * r_blocks

        o = output.reshape(N, C, hw)              # free reshape, no HBM pass
        t = target.reshape(N, C, hw)

        kernel = functools.partial(_epe_flat_kernel, nchan=C, hw=hw,
                                   block_p=block_p, mask_tail=mask_tail)
        partials = pl.pallas_call(
            kernel,
            out_shape=jax.ShapeDtypeStruct((n_steps, nb, 1), jnp.float32),
            grid_spec=pltpu.PrefetchScalarGridSpec(
                num_scalar_prefetch=0,
                grid=(n_blocks, r_blocks),
                in_specs=[
                    pl.BlockSpec((nb, C, block_p), lambda n, r: (n, 0, r)),
                    pl.BlockSpec((nb, C, block_p), lambda n, r: (n, 0, r)),
                ],
                out_specs=pl.BlockSpec(
                    (1, nb, 1), lambda n, r: (n * r_blocks + r, 0, 0)),
            ),
            compiler_params=compiler_params,
            cost_estimate=pl.CostEstimate(
                flops=4 * N * C * hw,
                transcendentals=N * hw,
                bytes_accessed=2 * N * C * hw * itemsize + n_steps * nb * 4),
        )(o, t)

    # Tree-reduce the per-block partials in the wrapper; divide by the true count.
    epe_mean = jnp.sum(partials) / jnp.float32(N * H * W)
    return [epe_mean]


def _epe_loss_ref(output, target):
    t = DIV_FLOW * target.astype(jnp.float32)
    o = output.astype(jnp.float32)
    epe_map = jnp.sqrt(jnp.sum((t - o) ** 2, axis=1))
    return [jnp.mean(epe_map)]


if __name__ == "__main__":
    key = jax.random.PRNGKey(0)
    k1, k2, k3, k4 = jax.random.split(key, 4)

    # Primary small test (H*W multiple of 128 -> dense path).
    N, C, H, W = 2, 4, 16, 16
    output = jax.random.normal(k1, (N, C, H, W), dtype=jnp.float32)
    target = jax.random.normal(k2, (N, C, H, W), dtype=jnp.float32)

    (loss,) = epe_loss(output, target)
    loss = jax.block_until_ready(loss)
    (ref,) = _epe_loss_ref(output, target)
    ref = jax.block_until_ready(ref)
    assert jnp.allclose(loss, ref, rtol=1e-5, atol=1e-6), (loss, ref)

    # Odd spatial shape (2-channel flow) exercising the ragged (masked) path.
    N2, C2, H2, W2 = 3, 2, 7, 9
    output2 = jax.random.normal(k3, (N2, C2, H2, W2), dtype=jnp.float32)
    target2 = jax.random.normal(k4, (N2, C2, H2, W2), dtype=jnp.float32)

    (loss2,) = epe_loss(output2, target2)
    loss2 = jax.block_until_ready(loss2)
    (ref2,) = _epe_loss_ref(output2, target2)
    ref2 = jax.block_until_ready(ref2)
    assert jnp.allclose(loss2, ref2, rtol=1e-5, atol=1e-6), (loss2, ref2)

    print("KERNEL_OK")
</pallas_src>

<mosaic_0001>
module attributes {stable_mosaic.version = 11 : i64} {
  func.func @_epe_dense_kernel(%arg0: i32, %arg1: i32, %arg2: memref<2x4x2x128xf32, #tpu.memory_space<vmem>>, %arg3: memref<2x4x2x128xf32, #tpu.memory_space<vmem>>, %arg4: memref<1x1x128xf32, #tpu.memory_space<vmem>>) attributes {dimension_semantics = [#tpu.dimension_semantics<parallel>, #tpu.dimension_semantics<parallel>], iteration_bounds = array<i64: 1, 1>, scalar_prefetch = 0 : i64, scratch_operands = 0 : i64, tpu.core_type = #tpu.core_type<tc>, window_params = [{transform_indices = @transform_0, window_bounds = array<i64: 2, 4, 2, 128>}, {transform_indices = @transform_1, window_bounds = array<i64: 2, 4, 2, 128>}, {transform_indices = @transform_2, window_bounds = array<i64: 1, 1, 128>}]} {
    %c0 = arith.constant 0 : index
    %c0_0 = arith.constant 0 : index
    %c0_1 = arith.constant 0 : index
    %c0_2 = arith.constant 0 : index
    %0 = vector.load %arg2[%c0, %c0_0, %c0_1, %c0_2] : memref<2x4x2x128xf32, #tpu.memory_space<vmem>>, vector<2x1x2x128xf32>
    %1 = vector.shape_cast %0 : vector<2x1x2x128xf32> to vector<2x2x128xf32>
    %c0_3 = arith.constant 0 : index
    %c0_4 = arith.constant 0 : index
    %c0_5 = arith.constant 0 : index
    %c0_6 = arith.constant 0 : index
    %2 = vector.load %arg3[%c0_3, %c0_4, %c0_5, %c0_6] : memref<2x4x2x128xf32, #tpu.memory_space<vmem>>, vector<2x1x2x128xf32>
    %3 = vector.shape_cast %2 : vector<2x1x2x128xf32> to vector<2x2x128xf32>
    %cst = arith.constant 5.000000e-02 : f32
    %4 = vector.broadcast %cst : f32 to vector<2x2x128xf32>
    %5 = arith.mulf %4, %3 : vector<2x2x128xf32>
    %6 = arith.subf %5, %1 : vector<2x2x128xf32>
    %7 = arith.mulf %6, %6 : vector<2x2x128xf32>
    %c0_7 = arith.constant 0 : index
    %c1 = arith.constant 1 : index
    %c0_8 = arith.constant 0 : index
    %c0_9 = arith.constant 0 : index
    %8 = vector.load %arg2[%c0_7, %c1, %c0_8, %c0_9] : memref<2x4x2x128xf32, #tpu.memory_space<vmem>>, vector<2x1x2x128xf32>
    %9 = vector.shape_cast %8 : vector<2x1x2x128xf32> to vector<2x2x128xf32>
    %c0_10 = arith.constant 0 : index
    %c1_11 = arith.constant 1 : index
    %c0_12 = arith.constant 0 : index
    %c0_13 = arith.constant 0 : index
    %10 = vector.load %arg3[%c0_10, %c1_11, %c0_12, %c0_13] : memref<2x4x2x128xf32, #tpu.memory_space<vmem>>, vector<2x1x2x128xf32>
    %11 = vector.shape_cast %10 : vector<2x1x2x128xf32> to vector<2x2x128xf32>
    %cst_14 = arith.constant 5.000000e-02 : f32
    %12 = vector.broadcast %cst_14 : f32 to vector<2x2x128xf32>
    %13 = arith.mulf %12, %11 : vector<2x2x128xf32>
    %14 = arith.subf %13, %9 : vector<2x2x128xf32>
    %15 = arith.mulf %14, %14 : vector<2x2x128xf32>
    %16 = arith.addf %7, %15 : vector<2x2x128xf32>
    %c0_15 = arith.constant 0 : index
    %c2 = arith.constant 2 : index
    %c0_16 = arith.constant 0 : index
    %c0_17 = arith.constant 0 : index
    %17 = vector.load %arg2[%c0_15, %c2, %c0_16, %c0_17] : memref<2x4x2x128xf32, #tpu.memory_space<vmem>>, vector<2x1x2x128xf32>
    %18 = vector.shape_cast %17 : vector<2x1x2x128xf32> to vector<2x2x128xf32>
    %c0_18 = arith.constant 0 : index
    %c2_19 = arith.constant 2 : index
    %c0_20 = arith.constant 0 : index
    %c0_21 = arith.constant 0 : index
    %19 = vector.load %arg3[%c0_18, %c2_19, %c0_20, %c0_21] : memref<2x4x2x128xf32, #tpu.memory_space<vmem>>, vector<2x1x2x128xf32>
    %20 = vector.shape_cast %19 : vector<2x1x2x128xf32> to vector<2x2x128xf32>
    %cst_22 = arith.constant 5.000000e-02 : f32
    %21 = vector.broadcast %cst_22 : f32 to vector<2x2x128xf32>
    %22 = arith.mulf %21, %20 : vector<2x2x128xf32>
    %23 = arith.subf %22, %18 : vector<2x2x128xf32>
    %24 = arith.mulf %23, %23 : vector<2x2x128xf32>
    %25 = arith.addf %16, %24 : vector<2x2x128xf32>
    %c0_23 = arith.constant 0 : index
    %c3 = arith.constant 3 : index
    %c0_24 = arith.constant 0 : index
    %c0_25 = arith.constant 0 : index
    %26 = vector.load %arg2[%c0_23, %c3, %c0_24, %c0_25] : memref<2x4x2x128xf32, #tpu.memory_space<vmem>>, vector<2x1x2x128xf32>
    %27 = vector.shape_cast %26 : vector<2x1x2x128xf32> to vector<2x2x128xf32>
    %c0_26 = arith.constant 0 : index
    %c3_27 = arith.constant 3 : index
    %c0_28 = arith.constant 0 : index
    %c0_29 = arith.constant 0 : index
    %28 = vector.load %arg3[%c0_26, %c3_27, %c0_28, %c0_29] : memref<2x4x2x128xf32, #tpu.memory_space<vmem>>, vector<2x1x2x128xf32>
    %29 = vector.shape_cast %28 : vector<2x1x2x128xf32> to vector<2x2x128xf32>
    %cst_30 = arith.constant 5.000000e-02 : f32
    %30 = vector.broadcast %cst_30 : f32 to vector<2x2x128xf32>
    %31 = arith.mulf %30, %29 : vector<2x2x128xf32>
    %32 = arith.subf %31, %27 : vector<2x2x128xf32>
    %33 = arith.mulf %32, %32 : vector<2x2x128xf32>
    %34 = arith.addf %25, %33 : vector<2x2x128xf32>
    %35 = math.sqrt %34 : vector<2x2x128xf32>
    %cst_31 = arith.constant dense<0.000000e+00> : vector<2x128xf32>
    %36 = vector.multi_reduction <add>, %35, %cst_31 [0] : vector<2x2x128xf32> to vector<2x128xf32>
    %cst_32 = arith.constant dense<0.000000e+00> : vector<128xf32>
    %37 = vector.multi_reduction <add>, %36, %cst_32 [0] : vector<2x128xf32> to vector<128xf32>
    %c0_33 = arith.constant 0 : index
    %c0_34 = arith.constant 0 : index
    %c0_35 = arith.constant 0 : index
    %38 = vector.load %arg4[%c0_33, %c0_34, %c0_35] : memref<1x1x128xf32, #tpu.memory_space<vmem>>, vector<1x1x128xf32>
    %39 = vector.shape_cast %38 : vector<1x1x128xf32> to vector<128xf32>
    %40 = vector.shape_cast %37 : vector<128xf32> to vector<1x1x128xf32>
    tpu.vector_store %arg4[%c0_33, %c0_34, %c0_35], %40 {strides = array<i32>} : memref<1x1x128xf32, #tpu.memory_space<vmem>>, vector<1x1x128xf32>,
    return
  }
  func.func @transform_0(%arg0: i32, %arg1: i32) -> (i32, i32, i32, i32) {
    %c0_i32 = arith.constant 0 : i32
    %c0_i32_0 = arith.constant 0 : i32
    %c0_i32_1 = arith.constant 0 : i32
    return %arg0, %c0_i32, %arg1, %c0_i32_0 : i32, i32, i32, i32
  }
  func.func @transform_1(%arg0: i32, %arg1: i32) -> (i32, i32, i32, i32) {
    %c0_i32 = arith.constant 0 : i32
    %c0_i32_0 = arith.constant 0 : i32
    %c0_i32_1 = arith.constant 0 : i32
    return %arg0, %c0_i32, %arg1, %c0_i32_0 : i32, i32, i32, i32
  }
  func.func @transform_2(%arg0: i32, %arg1: i32) -> (i32, i32, i32) {
    %c1_i32 = arith.constant 1 : i32
    %0 = arith.muli %arg0, %c1_i32 : i32
    %1 = arith.addi %0, %arg1 : i32
    %c0_i32 = arith.constant 0 : i32
    %c0_i32_0 = arith.constant 0 : i32
    %c0_i32_1 = arith.constant 0 : i32
    return %1, %c0_i32, %c0_i32_0 : i32, i32, i32
  }
}

</mosaic_0001>

<bundles_post_ra>
// kernel: tpu_custom_call.1
= control target key start
LH: loop header
LB: loop body
LE: loop exit
PB: predicated region body
PF: predicated region fallthrough
CT: control target
= control target key end

     0   :  { %7 = vsyncpa [#allocation3], 0  ;;  %s275_s0 = inlined_call_operand.hbm [shape: f32[2,4,2,128], index: 0, kind: input, shape index: {}]   ;;  %s276_s1 = inlined_call_operand.hbm [shape: f32[2,4,2,128], index: 1, kind: input, shape index: {}]   ;;  %s277_s2 = inlined_call_operand.hbm [shape: f32[1,1,128], index: 2, kind: output, shape index: {}]  }
   0x1   :  { %8 = vsyncpa [#allocation6], 0 }
   0x2   :  { %9 = vsyncpa [#allocation4], 0  ;;  %s219_s9 = smov [#allocation2]   ;;  %s147_s13 = scalar_lea.hbm %s275_s0, 256 }
   0x3   :  { %s15_s10 = sshll.u32 %s219_s9, 4  ;;  %p148_p0 = scmp.ne.s32.totalorder %s275_s0, %s147_s13  ;;  %s16_s10 = int_to_ptr.vmem [resolvable:$true] %s15_s10 }
   0x4   :  { %p151_p1 = scmp.lt.u32.totalorder %s147_s13, %s275_s0 }
   0x6   :  { %p153_p2 = pnand %p151_p1, %p148_p0 }
   0x8   :  { %156 = shalt.err (!%p153_p2)
}
   0x9   :  { %s157_s18 = scalar_lea.vmem %s16_s10, 256  ;;  %p162_p4 = scmp.lt.s32.totalorder %s16_s10, %s16_s10 }
   0xa   :  { %p158_p3 = scmp.ne.s32.totalorder %s16_s10, %s157_s18  ;;  %p163_p5 = scmp.lt.s32.totalorder %s157_s18, %s157_s18 }
   0xc   :  { %p164_p6 = por %p163_p5, %p162_p4 }
   0xe   :  { %p165_p7 = pnand %p164_p6, %p158_p3 }
  0x10   :  { %168 = shalt.err (!%p165_p7)
}
  0x11   :  { %s220_s19 = smov 32   ;;  %s221_s20 = smov 2  }
  0x12   :  { %21 = dma.hbm_to_vmem [thread:$0]  %s275_s0, 256, %s16_s10, [#allocation3], %s220_s19, %s220_s19, %s221_s20  }
  0x13   :  { %s222_s23 = smov [#allocation5]   ;;  %s169_s27 = scalar_lea.hbm %s276_s1, 256 }
  0x14   :  { %s27_s24 = sshll.u32 %s222_s23, 4  ;;  %p170_p8 = scmp.ne.s32.totalorder %s276_s1, %s169_s27  ;;  %s28_s24 = int_to_ptr.vmem [resolvable:$true] %s27_s24 }
  0x15   :  { %p173_p9 = scmp.lt.u32.totalorder %s169_s27, %s276_s1 }
  0x17   :  { %p175_p10 = pnand %p173_p9, %p170_p8 }
  0x19   :  { %178 = shalt.err (!%p175_p10)
}
  0x1a   :  { %s179_s4 = scalar_lea.vmem %s28_s24, 256  ;;  %p184_p12 = scmp.lt.s32.totalorder %s28_s24, %s28_s24 }
  0x1b   :  { %p180_p11 = scmp.ne.s32.totalorder %s28_s24, %s179_s4  ;;  %p185_p13 = scmp.lt.s32.totalorder %s179_s4, %s179_s4 }
  0x1d   :  { %p186_p0 = por %p185_p13, %p184_p12 }
  0x1f   :  { %p187_p1 = pnand %p186_p0, %p180_p11 }
  0x21   :  { %190 = shalt.err (!%p187_p1)
}
  0x22   :  { %33 = dma.hbm_to_vmem [thread:$0]  %s276_s1, 256, %s28_s24, [#allocation6], %s220_s19, %s220_s19, %s221_s20  }
  0x23   :  { %213 = dma.done.wait [#allocation3], 256  }
  0x24   :  { %214 = vsyncadd [#allocation3], 4294967040 }
  0x25   :  { %215 = dma.done.wait [#allocation6], 256  }
  0x26   :  { %216 = vsyncadd [#allocation6], 4294967040  ;;  %v41_v0 = vld [vmem:[#allocation2] sm:$0x3]  ;;  %v43_v1 = vld [vmem:[#allocation5] sm:$0x3] }
  0x27   :  { %v42_v2 = vld [vmem:[#allocation2 + $0x8] sm:$0x3]  ;;  %v44_v3 = vld [vmem:[#allocation5 + $0x8] sm:$0x3]  ;;  %v45_v4 = vmul.f32 0.05, %v43_v1 }
  0x28   :  { %v46_v5 = vmul.f32 0.05, %v44_v3  ;;  %v52_v6 = vld [vmem:[#allocation2 + $0x2] sm:$0x3]  ;;  %v55_v7 = vld [vmem:[#allocation5 + $0x2] sm:$0x3] }
  0x29   :  { %v47_v8 = vsub.f32 %v45_v4, %v41_v0  ;;  %v53_v9 = vld [vmem:[#allocation2 + $0xa] sm:$0x3]  ;;  %v56_v10 = vld [vmem:[#allocation5 + $0xa] sm:$0x3]  ;;  %v57_v11 = vmul.f32 0.05, %v55_v7 }
  0x2a   :  { %v48_v12 = vsub.f32 %v46_v5, %v42_v2  ;;  %v58_v13 = vmul.f32 0.05, %v56_v10  ;;  %v66_v14 = vld [vmem:[#allocation2 + $0x4] sm:$0x3]  ;;  %v69_v15 = vld [vmem:[#allocation5 + $0x4] sm:$0x3] }
  0x2b   :  { %v49_v16 = vmul.f32 %v47_v8, %v47_v8  ;;  %v59_v17 = vsub.f32 %v57_v11, %v52_v6  ;;  %v67_v18 = vld [vmem:[#allocation2 + $0xc] sm:$0x3]  ;;  %v70_v19 = vld [vmem:[#allocation5 + $0xc] sm:$0x3]  ;;  %v71_v20 = vmul.f32 0.05, %v69_v15 }
  0x2c   :  { %v50_v21 = vmul.f32 %v48_v12, %v48_v12  ;;  %v60_v22 = vsub.f32 %v58_v13, %v53_v9  ;;  %v72_v23 = vmul.f32 0.05, %v70_v19  ;;  %v80_v24 = vld [vmem:[#allocation2 + $0x6] sm:$0x3]  ;;  %v83_v25 = vld [vmem:[#allocation5 + $0x6] sm:$0x3] }
  0x2d   :  { %v61_v26 = vmul.f32 %v59_v17, %v59_v17  ;;  %v73_v27 = vsub.f32 %v71_v20, %v66_v14  ;;  %v81_v28 = vld [vmem:[#allocation2 + $0xe] sm:$0x3]  ;;  %v84_v29 = vld [vmem:[#allocation5 + $0xe] sm:$0x3]  ;;  %v85_v30 = vmul.f32 0.05, %v83_v25 }
  0x2e   :  { %v62_v31 = vmul.f32 %v60_v22, %v60_v22  ;;  %v74_v32 = vsub.f32 %v72_v23, %v67_v18  ;;  %v86_v33 = vmul.f32 0.05, %v84_v29  ;;  %vm107_vm4 = vcmask 1041408   ;;  %s223_s1 = smov [#allocation7]  }
  0x2f   :  { %v63_v34 = vadd.f32 %v61_v26, %v49_v16  ;;  %v75_v35 = vmul.f32 %v73_v27, %v73_v27  ;;  %v87_v36 = vsub.f32 %v85_v30, %v80_v24  ;;  %s128_s6 = sshll.u32 %s223_s1, 4  ;;  %s129_s6 = int_to_ptr.vmem [resolvable:$true] %s128_s6 }
  0x30   :  { %v64_v37 = vadd.f32 %v62_v31, %v50_v21  ;;  %v76_v38 = vmul.f32 %v74_v32, %v74_v32  ;;  %v88_v39 = vsub.f32 %v86_v33, %v81_v28  ;;  %s191_s7 = scalar_lea.vmem %s129_s6, 16  ;;  %s195_s8 = scalar_lea.vmem %s129_s6, 32 }
  0x31   :  { %v77_v40 = vadd.f32 %v75_v35, %v63_v34  ;;  %v89_v41 = vmul.f32 %v87_v36, %v87_v36  ;;  %p192_p2 = scmp.ne.s32.totalorder %s129_s6, %s191_s7  ;;  %p196_p3 = scmp.lt.s32.totalorder %s129_s6, %s129_s6 }
  0x32   :  { %v78_v42 = vadd.f32 %v76_v38, %v64_v37  ;;  %v90_v43 = vmul.f32 %v88_v39, %v88_v39  ;;  %p197_p4 = scmp.lt.s32.totalorder %s195_s8, %s191_s7 }
  0x33   :  { %v91_v44 = vadd.f32 %v89_v41, %v77_v40 }
  0x34   :  { %v92_v45 = vadd.f32 %v90_v43, %v78_v42  ;;  %p198_p5 = por %p197_p4, %p196_p3 }
  0x35   :  { %143 = vrsqrt.f32 %v91_v44  ;;  %vm95_vm0 = vcmp.eq.f32.partialorder %v91_v44, inf  ;;  %v98_v47 = vand.u32 2147483648, %v91_v44  ;;  %vm97_vm1 = vcmp.eq.f32.partialorder %v91_v44, 0.0 }
  0x36   :  { %145 = vrsqrt.f32 %v92_v45  ;;  %vm102_vm2 = vcmp.eq.f32.partialorder %v92_v45, inf  ;;  %v105_v50 = vand.u32 2147483648, %v92_v45  ;;  %vm104_vm3 = vcmp.eq.f32.partialorder %v92_v45, 0.0  ;;  %p199_p6 = pnand %p198_p5, %p192_p2 }
  0x3f   :  { %v144_v46 = vpop.eup %143 }
  0x40   :  { %v146_v48 = vpop.eup %145  ;;  %v94_v49 = vmul.f32 %v144_v46, %v91_v44 }
  0x41   :  { %v101_v51 = vmul.f32 %v146_v48, %v92_v45 }
  0x42   :  { %v96_v52 = vsel %vm95_vm0, %v91_v44, %v94_v49 }
  0x43   :  { %v99_v53 = vsel %vm97_vm1, %v98_v47, %v96_v52  ;;  %v103_v54 = vsel %vm102_vm2, %v92_v45, %v101_v51 }
  0x44   :  { %v106_v55 = vsel %vm104_vm3, %v105_v50, %v103_v54  ;;  %v108_v56 = vsel %vm107_vm4, %v99_v53, 0.0 }
  0x45   :  { %v109_v57 = vsel %vm107_vm4, %v106_v55, 0.0 }
  0x46   :  { %v110_v58 = vadd.f32 %v109_v57, %v108_v56 }
  0x48   :  { %v111_v59 = vsel %vm107_vm4, %v110_v58, 0.0 }
  0x49   :  { %v112_v60 = vrot.slane %v111_v59, 4 }
  0x4b   :  { %v113_v61 = vadd.f32 %v112_v60, %v111_v59 }
  0x4d   :  { %v114_v62 = vrot.slane %v113_v61, 2 }
  0x4f   :  { %v115_v63 = vadd.f32 %v114_v62, %v113_v61 }
  0x51   :  { %v116_v0 = vrot.slane %v115_v63, 1 }
  0x53   :  { %v117_v1 = vadd.f32 %v116_v0, %v115_v63 }
  0x55   :  { %118 = vst [vmem:[#allocation7] sm:$0x1] %v117_v1 }
  0x56   :  { %202 = shalt.err (!%p199_p6)
}
  0x57   :  { %s203_s11 = scalar_lea.hbm %s277_s2, 16 }
  0x58   :  { %p204_p7 = scmp.ne.s32.totalorder %s277_s2, %s203_s11  ;;  %p207_p8 = scmp.lt.u32.totalorder %s203_s11, %s277_s2 }
  0x5a   :  { %p209_p9 = pnand %p207_p8, %p204_p7 }
  0x5c   :  { %212 = shalt.err (!%p209_p9)
}
  0x5d   :  { %131 = dma.vmem_to_hbm [thread:$0]  %s129_s6, 16, %s277_s2, [#allocation4]  }
  0x5e   :  { %217 = dma.done.wait [#allocation4], 16  }
  0x5f   :  { %218 = vsyncadd [#allocation4], 4294967280 }
  0x60   :  { %135 = vsyncpa [#allocation3], 1 }
  0x61   :  { %136 = vsyncpa [#allocation6], 1 }
  0x62   :  { %137 = vsyncpa [#allocation4], 1 }

</bundles_post_ra>
